<compile_context>
chip_gen: v5e
topology: v5e:2x2
jax: 0.10.0
libtpu: 0.0.40
codegen_flags: <defaults>
</compile_context>

<pallas_src>
import jax
import jax.numpy as jnp
from jax.experimental import pallas as pl
from jax.experimental.pallas import tpu as pltpu  # noqa: F401  (TPU backend)

BN_EPS = 1e-5
LEAKY_SLOPE = 0.2
LANE = 128


def _cond_aug_kernel(x_ref, w1_ref, wmv_ref, vecs_ref, noise_ref, out_ref):
    d_lat = noise_ref.shape[-1]

    # matmul dtype / precision are a static, deliberate choice.
    mm_dtype = w1_ref.dtype
    prec = (jax.lax.Precision.HIGHEST if mm_dtype == jnp.float32
            else jax.lax.Precision.DEFAULT)

    # packed [1, 512] small-vector operand: [ gamma(128) | beta(128) | bmv(256) ]
    gamma = vecs_ref[:, :d_lat]
    beta = vecs_ref[:, d_lat:2 * d_lat]
    bmv = vecs_ref[:, 2 * d_lat:]

    # ---- text_embed Linear(384(pad of 300) -> 128); b1 omitted (BN-cancelled) ----
    x = x_ref[...]                                                   # [B, 384] f32
    h = jnp.dot(x.astype(mm_dtype), w1_ref[...],
                preferred_element_type=jnp.float32, precision=prec)  # [B, 128] f32

    # ---- BatchNorm1d(128), training mode (batch stats, biased variance) ----
    # one-pass variance E[h^2] - mu^2, clamped >= 0 (free vmax) before rsqrt.
    mu = jnp.mean(h, axis=0, keepdims=True)                          # [1, 128]
    var = jnp.maximum(jnp.mean(h * h, axis=0, keepdims=True) - mu * mu, 0.0)
    scale = jax.lax.rsqrt(var + BN_EPS) * gamma
    h_bn = (h - mu) * scale + beta

    # ---- LeakyReLU(0.2): max(h, 0.2*h) (exact for slope < 1) ----
    act = jnp.maximum(h_bn, LEAKY_SLOPE * h_bn)                      # [B, 128]

    # ---- fused embed_mean | embed_log_variance: Linear(128 -> 256) ----
    mv = jnp.dot(act.astype(mm_dtype), wmv_ref[...],
                 preferred_element_type=jnp.float32, precision=prec) + bmv
    mean = mv[:, :d_lat]                                             # [B, 128]
    logvar = mv[:, d_lat:]                                           # [B, 128]

    # ---- reparameterise: z = mean + exp(0.5 * logvar) * eps ----
    z = mean + jnp.exp(0.5 * logvar) * noise_ref[...]

    # packed lane-dense output slab [B, 384] = [ z | mean | logvar ],
    # written with two 128-aligned unmasked stores (no concatenate temp).
    out_ref[:, :d_lat] = z
    out_ref[:, d_lat:] = mv


def condition_augmentation(text_emb_padded, packed, noise):
    """text_emb_padded: [B, K_pad] f32 (K padded to a multiple of 128 upstream);
    noise: [B, 128] f32; packed: dict from pack_params.

    Returns (z, mean, logvar), each [B, 128] f32.
    """
    B, k_pad = text_emb_padded.shape
    d_lat = noise.shape[-1]

    args = (text_emb_padded, packed["w1"], packed["wmv"], packed["vecs"], noise)

    def full_spec(a):
        return pl.BlockSpec(a.shape, lambda: (0,) * a.ndim)

    in_bytes = sum(int(a.size) * a.dtype.itemsize for a in args)
    out_bytes = B * 3 * d_lat * 4
    cost = pl.CostEstimate(
        flops=2 * B * k_pad * d_lat + 2 * B * d_lat * (2 * d_lat) + 12 * B * d_lat,
        transcendentals=B * d_lat + d_lat,       # exp (reparam) + rsqrt (BN)
        bytes_accessed=in_bytes + out_bytes,
    )

    out = pl.pallas_call(
        _cond_aug_kernel,
        out_shape=jax.ShapeDtypeStruct((B, 3 * d_lat), jnp.float32),
        in_specs=[full_spec(a) for a in args],
        out_specs=pl.BlockSpec((B, 3 * d_lat), lambda: (0, 0)),
        cost_estimate=cost,
    )(*args)

    return out[:, :d_lat], out[:, d_lat:2 * d_lat], out[:, 2 * d_lat:]


def init_params(key, text_embedding_dim=300, text_embedding_latent=128):
    """Deterministic init mimicking PyTorch Linear defaults (uniform +-1/sqrt(fan_in))."""
    ks = jax.random.split(key, 6)

    def lin(kw, kb, fan_in, fan_out):
        bound = 1.0 / jnp.sqrt(fan_in)
        w = jax.random.uniform(kw, (fan_in, fan_out), jnp.float32, -bound, bound)
        b = jax.random.uniform(kb, (1, fan_out), jnp.float32, -bound, bound)
        return w, b

    w1, b1 = lin(ks[0], ks[1], text_embedding_dim, text_embedding_latent)
    wm, bm = lin(ks[2], ks[3], text_embedding_latent, text_embedding_latent)
    wv, bv = lin(ks[4], ks[5], text_embedding_latent, text_embedding_latent)
    gamma = jnp.ones((1, text_embedding_latent), jnp.float32)   # BatchNorm1d weight
    beta = jnp.zeros((1, text_embedding_latent), jnp.float32)   # BatchNorm1d bias
    return dict(w1=w1, b1=b1, gamma=gamma, beta=beta,
                wm=wm, bm=bm, wv=wv, bv=bv)


def pack_params(params, weights_dtype=jnp.bfloat16):
    """Pack natural params into the MXU/DMA-friendly layout consumed by the kernel.

    * w1 zero-padded on the contraction dim 300 -> 384 (3 x 128) and cast to
      `weights_dtype` (bf16 by default: half the weight-DMA bytes, single MXU pass).
    * wm|wv fused into one [128, 256] matmul operand.
    * gamma|beta|bm|bv fused into ONE [1, 512] f32 operand (single tiny DMA).
    * b1 intentionally dropped: cancelled exactly by training-mode BatchNorm.
    """
    d_in, d_lat = params["w1"].shape
    k_pad = ((d_in + LANE - 1) // LANE) * LANE                             # 300 -> 384
    w1 = jnp.pad(params["w1"], ((0, k_pad - d_in), (0, 0))).astype(weights_dtype)
    wmv = jnp.concatenate([params["wm"], params["wv"]], axis=1).astype(weights_dtype)
    vecs = jnp.concatenate(
        [params["gamma"], params["beta"], params["bm"], params["bv"]],
        axis=1).astype(jnp.float32)                                        # [1, 512]
    return dict(w1=w1, wmv=wmv, vecs=vecs)


def pad_text_emb(text_emb):
    """Pad the contraction dim to a multiple of 128 ONCE, upstream of the kernel."""
    d_in = text_emb.shape[-1]
    k_pad = ((d_in + LANE - 1) // LANE) * LANE
    return jnp.pad(text_emb, ((0, 0), (0, k_pad - d_in)))


def reference(text_emb, params, noise, mm_dtype=jnp.float32):
    """PyTorch-faithful reference. mm_dtype=bf16 mirrors the kernel's quantization."""
    def mm(a, w):
        return jnp.dot(a.astype(mm_dtype), w.astype(mm_dtype),
                       preferred_element_type=jnp.float32)
    h = mm(text_emb, params["w1"]) + params["b1"]
    mu = jnp.mean(h, axis=0, keepdims=True)
    var = jnp.mean((h - mu) ** 2, axis=0, keepdims=True)
    h = (h - mu) / jnp.sqrt(var + BN_EPS) * params["gamma"] + params["beta"]
    a = jnp.where(h >= 0, h, LEAKY_SLOPE * h)
    mean = mm(a, params["wm"]) + params["bm"]
    logvar = mm(a, params["wv"]) + params["bv"]
    z = mean + jnp.exp(0.5 * logvar) * noise
    return z, mean, logvar


if __name__ == "__main__":
    B, D_IN, D_LAT = 8, 300, 128
    key = jax.random.PRNGKey(0)
    k_x, k_p, k_n = jax.random.split(key, 3)

    text_emb = jax.random.normal(k_x, (B, D_IN), jnp.float32)
    params = init_params(k_p, D_IN, D_LAT)
    packed = pack_params(params)                              # bf16 weights by default
    noise = jax.random.normal(k_n, (B, D_LAT), jnp.float32)   # eps for reparameterise

    x_pad = pad_text_emb(text_emb)                            # pad once, upstream

    z, mean, logvar = jax.block_until_ready(
        condition_augmentation(x_pad, packed, noise))

    # Tight check: reference using the SAME bf16 matmul quantization as the kernel.
    z_q, mean_q, logvar_q = reference(text_emb, params, noise, mm_dtype=jnp.bfloat16)
    assert jnp.allclose(z, z_q, atol=1e-3, rtol=1e-3)
    assert jnp.allclose(mean, mean_q, atol=1e-3, rtol=1e-3)
    assert jnp.allclose(logvar, logvar_q, atol=1e-3, rtol=1e-3)

    # Loose sanity check vs. the full-f32 PyTorch-faithful reference (bounds the
    # bf16 weight-quantization error; use pack_params(weights_dtype=f32) for strict parity).
    z_r, mean_r, logvar_r = reference(text_emb, params, noise)
    assert jnp.allclose(z, z_r, atol=1e-1, rtol=1e-1)
    assert jnp.allclose(mean, mean_r, atol=1e-1, rtol=1e-1)
    assert jnp.allclose(logvar, logvar_r, atol=1e-1, rtol=1e-1)

    # TODO(synk): BatchNorm running_mean/running_var updates (training-mode side
    # effect of the PyTorch module) are not produced; forward outputs only.
    print("KERNEL_OK")
</pallas_src>

<mosaic_0001>
module attributes {stable_mosaic.version = 11 : i64} {
  func.func @_cond_aug_kernel(%arg0: memref<8x384xf32, #tpu.memory_space<vmem>>, %arg1: memref<384x128xbf16, #tpu.memory_space<vmem>>, %arg2: memref<128x256xbf16, #tpu.memory_space<vmem>>, %arg3: memref<1x512xf32, #tpu.memory_space<vmem>>, %arg4: memref<8x128xf32, #tpu.memory_space<vmem>>, %arg5: memref<8x384xf32, #tpu.memory_space<vmem>>) attributes {dimension_semantics = [], scalar_prefetch = 0 : i64, scratch_operands = 0 : i64, tpu.core_type = #tpu.core_type<tc>} {
    %c0 = arith.constant 0 : index
    %c0_0 = arith.constant 0 : index
    %0 = vector.load %arg3[%c0, %c0_0] : memref<1x512xf32, #tpu.memory_space<vmem>>, vector<1x128xf32>
    %c0_1 = arith.constant 0 : index
    %c128 = arith.constant 128 : index
    %1 = vector.load %arg3[%c0_1, %c128] : memref<1x512xf32, #tpu.memory_space<vmem>>, vector<1x128xf32>
    %c0_2 = arith.constant 0 : index
    %c256 = arith.constant 256 : index
    %2 = vector.load %arg3[%c0_2, %c256] : memref<1x512xf32, #tpu.memory_space<vmem>>, vector<1x256xf32>
    %c0_3 = arith.constant 0 : index
    %c0_4 = arith.constant 0 : index
    %3 = vector.load %arg0[%c0_3, %c0_4] : memref<8x384xf32, #tpu.memory_space<vmem>>, vector<8x384xf32>
    %4 = arith.truncf %3 : vector<8x384xf32> to vector<8x384xbf16>
    %c0_5 = arith.constant 0 : index
    %c0_6 = arith.constant 0 : index
    %5 = vector.load %arg1[%c0_5, %c0_6] : memref<384x128xbf16, #tpu.memory_space<vmem>>, vector<384x128xbf16>
    %cst = arith.constant dense<0.000000e+00> : vector<8x128xf32>
    %6 = tpu.matmul %4, %5, %cst {dimension_numbers = #tpu.dot_dimension_numbers<[1], [0], [0], [1], [0, 0, 1, 1], [], []>} : vector<8x384xbf16>, vector<384x128xbf16>, vector<8x128xf32> -> vector<8x128xf32>
    %cst_7 = arith.constant dense<0.000000e+00> : vector<128xf32>
    %7 = vector.multi_reduction <add>, %6, %cst_7 [0] : vector<8x128xf32> to vector<128xf32>
    %8 = vector.shape_cast %7 : vector<128xf32> to vector<1x128xf32>
    %cst_8 = arith.constant 8.000000e+00 : f32
    %9 = vector.broadcast %cst_8 : f32 to vector<1x128xf32>
    %10 = arith.divf %8, %9 : vector<1x128xf32>
    %11 = arith.mulf %6, %6 : vector<8x128xf32>
    %cst_9 = arith.constant dense<0.000000e+00> : vector<128xf32>
    %12 = vector.multi_reduction <add>, %11, %cst_9 [0] : vector<8x128xf32> to vector<128xf32>
    %13 = vector.shape_cast %12 : vector<128xf32> to vector<1x128xf32>
    %cst_10 = arith.constant 8.000000e+00 : f32
    %14 = vector.broadcast %cst_10 : f32 to vector<1x128xf32>
    %15 = arith.divf %13, %14 : vector<1x128xf32>
    %16 = arith.mulf %10, %10 : vector<1x128xf32>
    %17 = arith.subf %15, %16 : vector<1x128xf32>
    %cst_11 = arith.constant 0.000000e+00 : f32
    %18 = vector.broadcast %cst_11 : f32 to vector<1x128xf32>
    %19 = arith.maximumf %17, %18 : vector<1x128xf32>
    %cst_12 = arith.constant 9.99999974E-6 : f32
    %20 = vector.broadcast %cst_12 : f32 to vector<1x128xf32>
    %21 = arith.addf %19, %20 : vector<1x128xf32>
    %22 = math.rsqrt %21 : vector<1x128xf32>
    %23 = arith.mulf %22, %0 : vector<1x128xf32>
    %24 = vector.broadcast %10 : vector<1x128xf32> to vector<8x128xf32>
    %25 = arith.subf %6, %24 : vector<8x128xf32>
    %26 = vector.broadcast %23 : vector<1x128xf32> to vector<8x128xf32>
    %27 = arith.mulf %25, %26 : vector<8x128xf32>
    %28 = vector.broadcast %1 : vector<1x128xf32> to vector<8x128xf32>
    %29 = arith.addf %27, %28 : vector<8x128xf32>
    %cst_13 = arith.constant 2.000000e-01 : f32
    %30 = vector.broadcast %cst_13 : f32 to vector<8x128xf32>
    %31 = arith.mulf %30, %29 : vector<8x128xf32>
    %32 = arith.maximumf %29, %31 : vector<8x128xf32>
    %33 = arith.truncf %32 : vector<8x128xf32> to vector<8x128xbf16>
    %c0_14 = arith.constant 0 : index
    %c0_15 = arith.constant 0 : index
    %34 = vector.load %arg2[%c0_14, %c0_15] : memref<128x256xbf16, #tpu.memory_space<vmem>>, vector<128x256xbf16>
    %cst_16 = arith.constant dense<0.000000e+00> : vector<8x256xf32>
    %35 = tpu.matmul %33, %34, %cst_16 {dimension_numbers = #tpu.dot_dimension_numbers<[1], [0], [0], [1], [0, 0, 1, 1], [], []>} : vector<8x128xbf16>, vector<128x256xbf16>, vector<8x256xf32> -> vector<8x256xf32>
    %36 = vector.broadcast %2 : vector<1x256xf32> to vector<8x256xf32>
    %37 = arith.addf %35, %36 : vector<8x256xf32>
    %38 = vector.extract_strided_slice %37 {offsets = [0, 0], sizes = [8, 128], strides = [1, 1]} : vector<8x256xf32> to vector<8x128xf32>
    %39 = vector.extract_strided_slice %37 {offsets = [0, 128], sizes = [8, 128], strides = [1, 1]} : vector<8x256xf32> to vector<8x128xf32>
    %cst_17 = arith.constant 5.000000e-01 : f32
    %40 = vector.broadcast %cst_17 : f32 to vector<8x128xf32>
    %41 = arith.mulf %40, %39 : vector<8x128xf32>
    %42 = math.exp %41 : vector<8x128xf32>
    %c0_18 = arith.constant 0 : index
    %c0_19 = arith.constant 0 : index
    %43 = vector.load %arg4[%c0_18, %c0_19] : memref<8x128xf32, #tpu.memory_space<vmem>>, vector<8x128xf32>
    %44 = arith.mulf %42, %43 : vector<8x128xf32>
    %45 = arith.addf %38, %44 : vector<8x128xf32>
    %c0_20 = arith.constant 0 : index
    %c0_21 = arith.constant 0 : index
    %46 = vector.load %arg5[%c0_20, %c0_21] : memref<8x384xf32, #tpu.memory_space<vmem>>, vector<8x128xf32>
    tpu.vector_store %arg5[%c0_20, %c0_21], %45 {strides = array<i32>} : memref<8x384xf32, #tpu.memory_space<vmem>>, vector<8x128xf32>,
    %c0_22 = arith.constant 0 : index
    %c128_23 = arith.constant 128 : index
    %47 = vector.load %arg5[%c0_22, %c128_23] : memref<8x384xf32, #tpu.memory_space<vmem>>, vector<8x256xf32>
    tpu.vector_store %arg5[%c0_22, %c128_23], %37 {strides = array<i32>} : memref<8x384xf32, #tpu.memory_space<vmem>>, vector<8x256xf32>,
    return
  }
}

</mosaic_0001>

<bundles_post_ra>
// kernel: tpu_custom_call.1
= control target key start
LH: loop header
LB: loop body
LE: loop exit
PB: predicated region body
PF: predicated region fallthrough
CT: control target
= control target key end

     0   :  { %10 = vsyncpa [#allocation3], 0  ;;  %s971_s0 = inlined_call_operand.hbm [shape: f32[8,384], index: 0, kind: input, shape index: {}]   ;;  %s972_s1 = inlined_call_operand.hbm [shape: bf16[384,128], index: 1, kind: input, shape index: {}]   ;;  %s973_s2 = inlined_call_operand.hbm [shape: bf16[128,256], index: 2, kind: input, shape index: {}]   ;;  %s974_s3 = inlined_call_operand.hbm [shape: f32[1,512], index: 3, kind: input, shape index: {}]   ;;  %s975_s4 = inlined_call_operand.hbm [shape: f32[8,128], index: 4, kind: input, shape index: {}]   ;;  %s976_s5 = inlined_call_operand.hbm [shape: f32[8,384], index: 5, kind: output, shape index: {}]  }
   0x1   :  { %11 = vsyncpa [#allocation6], 0 }
   0x2   :  { %12 = vsyncpa [#allocation9], 0  ;;  %s29_s20 = sshll.u32 %s972_s1, 4  ;;  %s30_s20 = int_to_ptr.hbm [resolvable:$true] %s29_s20 }
   0x3   :  { %13 = vsyncpa [#allocation4], 0  ;;  %s905_s21 = smov [#allocation5]   ;;  %s56_s25 = sshll.u32 %s974_s3, 4  ;;  %s57_s25 = int_to_ptr.hbm [resolvable:$true] %s56_s25 }
   0x4   :  { %s31_s22 = sshll.u32 %s905_s21, 4  ;;  %s906_s26 = smov 64   ;;  %s32_s22 = int_to_ptr.vmem [resolvable:$true] %s31_s22 }
   0x5   :  { %s907_s27 = smov 4   ;;  %s908_s28 = smov [#allocation8]  }
   0x6   :  { %37 = dma.hbm_to_vmem [thread:$0]  %s30_s20, 3072, %s32_s22, [#allocation6], %s906_s26, %s906_s26, %s907_s27  }
   0x7   :  { %s58_s29 = sshll.u32 %s908_s28, 4  ;;  %s19_s7 = sshll.u32 %s971_s0, 4  ;;  %s59_s29 = int_to_ptr.vmem [resolvable:$true] %s58_s29  ;;  %s20_s7 = int_to_ptr.hbm [resolvable:$true] %s19_s7 }
   0x8   :  { %61 = dma.hbm_to_vmem [thread:$0]  %s57_s25, 64, %s59_s29, [#allocation9]  }
   0x9   :  { %s42_s9 = sshll.u32 %s973_s2, 4  ;;  %s909_s10 = smov [#allocation2]   ;;  %s43_s9 = int_to_ptr.hbm [resolvable:$true] %s42_s9 }
   0xa   :  { %s21_s11 = sshll.u32 %s909_s10, 4  ;;  %s910_s3 = smov [#allocation7]   ;;  %s22_s11 = int_to_ptr.vmem [resolvable:$true] %s21_s11 }
   0xb   :  { %24 = dma.hbm_to_vmem [thread:$0]  %s20_s7, 384, %s22_s11, [#allocation3]  }
   0xc   :  { %s44_s12 = sshll.u32 %s910_s3, 4  ;;  %s911_s13 = smov 128   ;;  %s45_s12 = int_to_ptr.vmem [resolvable:$true] %s44_s12 }
   0xd   :  { %s912_s14 = smov 8   ;;  %s67_s16 = sshll.u32 %s975_s4, 4  ;;  %s68_s16 = int_to_ptr.hbm [resolvable:$true] %s67_s16 }
   0xe   :  { %50 = dma.hbm_to_vmem [thread:$0]  %s43_s9, 2048, %s45_s12, [#allocation6], %s911_s13, %s911_s13, %s912_s14  }
   0xf   :  { %s913_s17 = smov [#allocation10]  }
  0x10   :  { %s69_s18 = sshll.u32 %s913_s17, 4  ;;  %s70_s18 = int_to_ptr.vmem [resolvable:$true] %s69_s18 }
  0x11   :  { %72 = dma.hbm_to_vmem [thread:$0]  %s68_s16, 128, %s70_s18, [#allocation9]  }
  0x12   :  { %897 = dma.done.wait [#allocation3], 384  }
  0x13   :  { %898 = vsyncadd [#allocation3], 4294966912 }
  0x14   :  { %899 = dma.done.wait [#allocation6], 5120  }
  0x15   :  { %900 = vsyncadd [#allocation6], 4294962176 }
  0x16   :  { %901 = dma.done.wait [#allocation9], 192  }
  0x17   :  { %902 = vsyncadd [#allocation9], 4294967104  ;;  %v702_v0 = vld [vmem:[#allocation5 + $0x38] sm:$0xff]  ;;  %v701_v3 = vld [vmem:[#allocation5 + $0x30] sm:$0xff]  ;;  %v914_v46 = vmov 8.0   ;;  %s915_s2 = smov [#allocation11]  }
  0x18   :  { %v710_v1 = vld [vmem:[#allocation5 + $0x78] sm:$0xff]  ;;  %294 = vmatpush.bf16.msra.mxu0 %v702_v0  ;;  %v709_v4 = vld [vmem:[#allocation5 + $0x70] sm:$0xff]  ;;  %v700_v6 = vld [vmem:[#allocation5 + $0x28] sm:$0xff]  ;;  %747 = vrcp.f32 %v914_v46  ;;  %s521_s4 = sshll.u32 %s915_s2, 4  ;;  %s523_s21 = sshll.u32 %s976_s5, 4  ;;  %s522_s4 = int_to_ptr.vmem [resolvable:$true] %s521_s4  ;;  %s524_s21 = int_to_ptr.hbm [resolvable:$true] %s523_s21 }
  0x19   :  { %v718_v2 = vld [vmem:[#allocation5 + $0xb8] sm:$0xff]  ;;  %307 = vmatpush.bf16.msra.mxu1 %v710_v1  ;;  %v717_v5 = vld [vmem:[#allocation5 + $0xb0] sm:$0xff]  ;;  %v708_v7 = vld [vmem:[#allocation5 + $0x68] sm:$0xff] }
  0x1a   :  { %320 = vmatpush.bf16.msra.mxu2 %v718_v2  ;;  %v716_v8 = vld [vmem:[#allocation5 + $0xa8] sm:$0xff]  ;;  %v699_v9 = vld [vmem:[#allocation5 + $0x20] sm:$0xff]  ;;  %v698_v12 = vld [vmem:[#allocation5 + $0x18] sm:$0xff] }
  0x1b   :  { %v707_v10 = vld [vmem:[#allocation5 + $0x60] sm:$0xff]  ;;  %v706_v13 = vld [vmem:[#allocation5 + $0x58] sm:$0xff]  ;;  %v697_v15 = vld [vmem:[#allocation5 + $0x10] sm:$0xff] }
  0x1c   :  { %295 = vmatpush.bf16.msra.mxu0 %v701_v3  ;;  %v715_v11 = vld [vmem:[#allocation5 + $0xa0] sm:$0xff]  ;;  %v714_v14 = vld [vmem:[#allocation5 + $0x98] sm:$0xff]  ;;  %v705_v16 = vld [vmem:[#allocation5 + $0x50] sm:$0xff] }
  0x1d   :  { %308 = vmatpush.bf16.msra.mxu1 %v709_v4  ;;  %v713_v17 = vld [vmem:[#allocation5 + $0x90] sm:$0xff]  ;;  %v696_v18 = vld [vmem:[#allocation5 + $0x8] sm:$0xff]  ;;  %v695_v21 = vld [vmem:[#allocation5] sm:$0xff] }
  0x1e   :  { %321 = vmatpush.bf16.msra.mxu2 %v717_v5  ;;  %v704_v19 = vld [vmem:[#allocation5 + $0x48] sm:$0xff]  ;;  %v703_v22 = vld [vmem:[#allocation5 + $0x40] sm:$0xff]  ;;  %v97_v24 = vld [vmem:[#allocation2 + $0x8] sm:$0xff]  ;;  %v748_v54 = vpop.eup %747 }
  0x1f   :  { %v712_v20 = vld [vmem:[#allocation5 + $0x88] sm:$0xff]  ;;  %v711_v25 = vld [vmem:[#allocation5 + $0x80] sm:$0xff]  ;;  %v98_v26 = vld [vmem:[#allocation2 + $0x10] sm:$0xff]  ;;  %v100_v28 = vpack.c.bf16 %v97_v24, %v97_v24  ;;  %v340_v63 = vmul.f32 8.0, %v748_v54  ;;  %vm344_vm0 = vweird.f32 %v748_v54 }
  0x20   :  { %296 = vmatpush.bf16.msra.mxu0 %v700_v6  ;;  %v96_v23 = vld [vmem:[#allocation2] sm:$0xff]  ;;  %v101_v29 = vpack.c.bf16 %v98_v26, %v98_v26  ;;  %v689_v30 = vld [vmem:[#allocation7 + $0x70] sm:$0xf]  ;;  %v734_v31 = vld [vmem:[#allocation7 + $0x74] sm:$0xf0] }
  0x21   :  { %309 = vmatpush.bf16.msra.mxu1 %v708_v7  ;;  %v99_v27 = vpack.c.bf16 %v96_v23, %v96_v23  ;;  %v733_v32 = vld [vmem:[#allocation7 + $0x74] sm:$0xf]  ;;  %v690_v33 = vor.u32 %v734_v31, %v689_v30  ;;  %v691_v34 = vld [vmem:[#allocation7 + $0x78] sm:$0xf0]  ;;  %v681_v35 = vld [vmem:[#allocation7 + $0x60] sm:$0xf] }
  0x22   :  { %322 = vmatpush.bf16.msra.mxu2 %v716_v8  ;;  %v732_v36 = vld [vmem:[#allocation7 + $0x64] sm:$0xf0]  ;;  %v694_v37 = vor.u32 %v733_v32, %v691_v34  ;;  %v731_v38 = vld [vmem:[#allocation7 + $0x64] sm:$0xf]  ;;  %v683_v39 = vld [vmem:[#allocation7 + $0x68] sm:$0xf0] }
  0x23   :  { %481 = vmatpush.bf16.msra.mxu3 %v690_v33  ;;  %v682_v40 = vor.u32 %v732_v36, %v681_v35  ;;  %v686_v41 = vor.u32 %v731_v38, %v683_v39  ;;  %v673_v42 = vld [vmem:[#allocation7 + $0x50] sm:$0xf]  ;;  %v730_v43 = vld [vmem:[#allocation7 + $0x54] sm:$0xf0]  ;;  %v729_v44 = vld [vmem:[#allocation7 + $0x54] sm:$0xf] }
  0x24   :  { %297 = vmatpush.bf16.msra.mxu0 %v699_v9  ;;  %v675_v45 = vld [vmem:[#allocation7 + $0x58] sm:$0xf0]  ;;  %v674_v47 = vor.u32 %v730_v43, %v673_v42  ;;  %v665_v49 = vld [vmem:[#allocation7 + $0x40] sm:$0xf]  ;;  %v728_v50 = vld [vmem:[#allocation7 + $0x44] sm:$0xf0] }
  0x25   :  { %310 = vmatpush.bf16.msra.mxu1 %v707_v10  ;;  %v678_v48 = vor.u32 %v729_v44, %v675_v45  ;;  %v727_v51 = vld [vmem:[#allocation7 + $0x44] sm:$0xf]  ;;  %v667_v52 = vld [vmem:[#allocation7 + $0x48] sm:$0xf0]  ;;  %v666_v53 = vor.u32 %v728_v50, %v665_v49  ;;  %v657_v58 = vld [vmem:[#allocation7 + $0x30] sm:$0xf] }
  0x26   :  { %323 = vmatpush.bf16.msra.mxu2 %v715_v11  ;;  %v670_v57 = vor.u32 %v727_v51, %v667_v52  ;;  %v726_v59 = vld [vmem:[#allocation7 + $0x34] sm:$0xf0]  ;;  %v725_v60 = vld [vmem:[#allocation7 + $0x34] sm:$0xf]  ;;  %v659_v61 = vld [vmem:[#allocation7 + $0x38] sm:$0xf0] }
  0x27   :  { %482 = vmatpush.bf16.msra.mxu3 %v682_v40  ;;  %v658_v62 = vor.u32 %v726_v59, %v657_v58  ;;  %v662_v1 = vor.u32 %v725_v60, %v659_v61  ;;  %v649_v2 = vld [vmem:[#allocation7 + $0x20] sm:$0xf]  ;;  %v724_v3 = vld [vmem:[#allocation7 + $0x24] sm:$0xf0]  ;;  %v723_v4 = vld [vmem:[#allocation7 + $0x24] sm:$0xf] }
  0x28   :  { %298 = vmatpush.bf16.msra.mxu0 %v698_v12  ;;  %v651_v5 = vld [vmem:[#allocation7 + $0x28] sm:$0xf0]  ;;  %v650_v7 = vor.u32 %v724_v3, %v649_v2  ;;  %v341_v8 = vsub.f32 1.0, %v340_v63  ;;  %v633_v24 = vld [vmem:[#allocation7] sm:$0xf] }
  0x29   :  { %311 = vmatpush.bf16.msra.mxu1 %v706_v13  ;;  %v654_v12 = vor.u32 %v723_v4, %v651_v5  ;;  %v641_v13 = vld [vmem:[#allocation7 + $0x10] sm:$0xf]  ;;  %v719_v26 = vld [vmem:[#allocation7 + $0x4] sm:$0xf]  ;;  %v746_v59 = vld [vmem:[#allocation8 + $0x1] ss:$0 sm:$0xff] }
  0x2a   :  { %324 = vmatpush.bf16.msra.mxu2 %v714_v14  ;;  %v722_v14 = vld [vmem:[#allocation7 + $0x14] sm:$0xf0] }
  0x2b   :  { %483 = vmatpush.bf16.msra.mxu3 %v674_v47 }
  0x2c   :  { %299 = vmatpush.bf16.msra.mxu0 %v697_v15  ;;  %v721_v15 = vld [vmem:[#allocation7 + $0x14] sm:$0xf] }
  0x2d   :  { %312 = vmatpush.bf16.msra.mxu1 %v705_v16  ;;  %v643_v16 = vld [vmem:[#allocation7 + $0x18] sm:$0xf0] }
  0x2e   :  { %325 = vmatpush.bf16.msra.mxu2 %v713_v17  ;;  %v646_v23 = vor.u32 %v721_v15, %v643_v16 }
  0x2f   :  { %484 = vmatpush.bf16.msra.mxu3 %v666_v53  ;;  %v93_v53 = vld [vmem:[#allocation8] sm:$0x1] }
  0x30   :  { %300 = vmatpush.bf16.msra.mxu0 %v696_v18 }
  0x31   :  { %313 = vmatpush.bf16.msra.mxu1 %v704_v19  ;;  %v642_v19 = vor.u32 %v722_v14, %v641_v13 }
  0x32   :  { %326 = vmatpush.bf16.msra.mxu2 %v712_v20  ;;  %v342_v20 = vmul.f32 %v748_v54, %v341_v8 }
  0x33   :  { %485 = vmatpush.bf16.msra.mxu3 %v658_v62 }
  0x34   :  { %301 = vmatpush.bf16.msra.mxu0 %v695_v21  ;;  %v343_v32 = vadd.f32 %v748_v54, %v342_v20 }
  0x35   :  { %314 = vmatpush.bf16.msra.mxu1 %v703_v22 }
  0x36   :  { %327 = vmatpush.bf16.msra.mxu2 %v711_v25  ;;  %v720_v25 = vld [vmem:[#allocation7 + $0x4] sm:$0xf0]  ;;  %v345_v38 = vsel %vm344_vm0, %v748_v54, %v343_v32 }
  0x37   :  { %302 = vmatmul.bf16.vlgmr.msra.gmra.mxu0 %v99_v27  ;;  %486 = vmatpush.bf16.msra.mxu3 %v650_v7  ;;  %v635_v27 = vld [vmem:[#allocation7 + $0x8] sm:$0xf0]  ;;  %v634_v31 = vor.u32 %v720_v25, %v633_v24 }
  0x38   :  { %315 = vmatmul.bf16.vlgmr.msra.gmra.mxu1 %v100_v28  ;;  %494 = vmatpush.bf16.msrb.mxu0 %v694_v37  ;;  %v638_v35 = vor.u32 %v719_v26, %v635_v27 }
  0x39   :  { %328 = vmatmul.bf16.vlgmr.msra.gmra.mxu2 %v101_v29 }
  0x3b   :  { %487 = vmatpush.bf16.msra.mxu3 %v642_v19 }
  0x3c   :  { %495 = vmatpush.bf16.msrb.mxu0 %v686_v41 }
  0x3f   :  { %488 = vmatpush.bf16.msra.mxu3 %v634_v31 }
  0x40   :  { %496 = vmatpush.bf16.msrb.mxu0 %v678_v48 }
  0x44   :  { %497 = vmatpush.bf16.msrb.mxu0 %v670_v57 }
  0x48   :  { %498 = vmatpush.bf16.msrb.mxu0 %v662_v1  ;;  %v95_v1 = vld [vmem:[#allocation8 + $0x2] sm:$0x3] }
  0x49   :  { %v398_v2 = vperm.slane %v95_v1, 1 }
  0x4c   :  { %499 = vmatpush.bf16.msrb.mxu0 %v654_v12 }
  0x50   :  { %500 = vmatpush.bf16.msrb.mxu0 %v646_v23 }
  0x54   :  { %501 = vmatpush.bf16.msrb.mxu0 %v638_v35 }
  0xb4   :  { %v303_v55 = vpop.f32.mrf.mxu0 }
  0xb5   :  { %v316_v56 = vpop.f32.mrf.mxu1 }
  0xb6   :  { %v317_v0 = vadd.f32 %v316_v56, %v303_v55 }
  0xbc   :  { %v329_v6 = vpop.f32.mrf.mxu2  ;;  %v305_v10 = vpop.f32.mrf.mxu0 }
  0xbd   :  { %v961_v9 = vadd.f32 %v329_v6, %v317_v0  ;;  %v318_v11 = vpop.f32.mrf.mxu1  ;;  %v397_v6 = vperm.slane %v95_v1, 0 }
  0xbe   :  { %v510_v11 = vld [vmem:[#allocation10] sm:$0xff] }
  0xbf   :  { %v333_v17 = vrot.slane %v961_v9, 4  ;;  %v347_v18 = vmul.f32 %v961_v9, %v961_v9 }
  0xc1   :  { %v334_v21 = vadd.f32 %v333_v17, %v961_v9  ;;  %v348_v22 = vrot.slane %v347_v18, 4 }
  0xc3   :  { %v335_v28 = vrot.slane %v334_v21, 2  ;;  %v349_v29 = vadd.f32 %v348_v22, %v347_v18 }
  0xc4   :  { %v331_v30 = vpop.f32.mrf.mxu2 }
  0xc5   :  { %v336_v33 = vadd.f32 %v335_v28, %v334_v21  ;;  %v350_v34 = vrot.slane %v349_v29, 2 }
  0xc7   :  { %v337_v36 = vrot.slane %v336_v33, 1  ;;  %v351_v37 = vadd.f32 %v350_v34, %v349_v29 }
  0xc9   :  { %v352_v39 = vrot.slane %v351_v37, 1  ;;  %v338_v40 = vadd.f32 %v337_v36, %v336_v33 }
  0xcb   :  { %v346_v41 = vmul.f32 %v345_v38, %v338_v40  ;;  %v353_v42 = vadd.f32 %v352_v39, %v351_v37 }
  0xcd   :  { %v354_v43 = vmul.f32 %v353_v42, %v345_v38  ;;  %v355_v44 = vmul.f32 %v346_v41, %v346_v41  ;;  %v370_v57 = vsub.f32 %v961_v9, %v346_v41 }
  0xcf   :  { %v356_v45 = vsub.f32 %v354_v43, %v355_v44 }
  0xd1   :  { %v357_v46 = vmax.f32 %v356_v45, 0.0 }
  0xd3   :  { %v358_v47 = vadd.f32 1e-05, %v357_v46 }
  0xd5   :  { %749 = vrsqrt.f32 %v358_v47  ;;  %vm365_vm2 = vweird.f32 %v358_v47 }
  0xdb   :  { %v750_v48 = vpop.eup %749 }
  0xdc   :  { %v360_v49 = vmul.f32 %v750_v48, %v358_v47  ;;  %vm366_vm1 = vweird.f32 %v750_v48 }
  0xdd   :  { %vm367_vm3 = vmor %vm365_vm2, %vm366_vm1 }
  0xde   :  { %v361_v50 = vmul.f32 %v750_v48, %v360_v49 }
  0xe0   :  { %v362_v51 = vmul.f32 0.5, %v361_v50 }
  0xe2   :  { %v363_v52 = vsub.f32 1.5, %v362_v51 }
  0xe4   :  { %v364_v55 = vmul.f32 %v750_v48, %v363_v52 }
  0xe6   :  { %v368_v54 = vsel %vm367_vm3, %v750_v48, %v364_v55 }
  0xe7   :  { %v369_v56 = vmul.f32 %v368_v54, %v93_v53 }
  0xe9   :  { %v371_v58 = vperm.slane %v369_v56, 0 }
  0xeb   :  { %v372_v60 = vmul.f32 %v371_v58, %v370_v57 }
  0xed   :  { %v376_v61 = vadd.f32 %v746_v59, %v372_v60 }
  0xef   :  { %v377_v62 = vmul.f32 0.2, %v376_v61 }
  0xf1   :  { %v378_v63 = vmax.f32 %v376_v61, %v377_v62 }
  0xf3   :  { %v379_v0 = vpack.c.bf16 %v378_v63, %v378_v63 }
  0xf5   :  { %489 = vmatmul.bf16.vlgmr.msra.gmra.mxu3 %v379_v0  ;;  %502 = vmatmul.bf16.vlgmr.msrb.gmra.mxu0 %v379_v0 }
 0x172   :  { %v503_v3 = vpop.f32.mrf.mxu0 }
 0x173   :  { %v504_v4 = vadd.f32 %v503_v3, %v398_v2 }
 0x175   :  { %v507_v5 = vmul.f32 0.5, %v504_v4  ;;  %515 = vst [vmem:[#allocation11 + $0x10] sm:$0xff] %v504_v4 }
 0x177   :  { %v508_v7 = vmul.f32 1.442695, %v507_v5 }
 0x178   :  { %v490_v8 = vpop.f32.mrf.mxu3 }
 0x179   :  { %751 = vpow2.f32 %v508_v7  ;;  %v491_v9 = vadd.f32 %v490_v8, %v397_v6 }
 0x17a   :  { %v505_v10 = vpop.f32.mrf.mxu0 }
 0x17b   :  { %514 = vst [vmem:[#allocation11 + $0x8] sm:$0xff] %v491_v9 }
 0x17f   :  { %v752_v12 = vpop.eup %751 }
 0x180   :  { %v511_v13 = vmul.f32 %v752_v12, %v510_v11  ;;  %v492_v14 = vpop.f32.mrf.mxu3 }
 0x182   :  { %v512_v15 = vadd.f32 %v511_v13, %v491_v9 }
 0x184   :  { %513 = vst [vmem:[#allocation11] sm:$0xff] %v512_v15 }
 0x185   :  { %526 = dma.vmem_to_hbm [thread:$0]  %s522_s4, 384, %s524_s21, [#allocation4]  }
 0x186   :  { %903 = dma.done.wait [#allocation4], 384  }
 0x187   :  { %904 = vsyncadd [#allocation4], 4294966912 }
 0x188   :  { %531 = vsyncpa [#allocation3], 1 }
 0x189   :  { %532 = vsyncpa [#allocation6], 1 }
 0x18a   :  { %533 = vsyncpa [#allocation9], 1 }
 0x18b   :  { %534 = vsyncpa [#allocation4], 1 }

</bundles_post_ra>
